<compile_context>
chip_gen: v5e
topology: v5e:2x2
jax: 0.10.0
libtpu: 0.0.40
codegen_flags: <defaults>
</compile_context>

<pallas_src>
import jax
import jax.numpy as jnp
import numpy as np
from jax.experimental import pallas as pl
from jax.experimental.pallas import tpu as pltpu


def _stacked_attention_kernel(v_ref, u_ref, p_ref, out_ref):
    # v_ref  : (N, D, HW) f32 -- channels on sublanes, spatial on lanes
    # u_ref  : (N, D)     f32
    # p_ref  : (K, 2D+2)  f32 -- packed [Wv | Wu | bv+bu | wp]
    # out_ref: (N, D)     f32 -- u + v_tilde
    N, D, HW = v_ref.shape
    K = p_ref.shape[0]

    v = v_ref[...]                                         # (N, D, HW)
    u = u_ref[...]                                         # (N, D)
    params = p_ref[...]                                    # (K, 2D+2)
    wv = params[:, 0:D]                                    # (K, D)
    wu = params[:, D:2 * D]                                # (K, D)
    bvu = params[:, 2 * D:2 * D + 1]                       # (K, 1) == bv + bu
    wp = params[:, 2 * D + 1:2 * D + 2]                    # (K, 1)

    # ---- projections: depth-D broadcast-MACs on the VPU (no MXU at D=4) ----
    # v_proj[n, k, hw] = sum_d Wv[k, d] * v[n, d, hw]
    # u_proj[n, k]     = sum_d Wu[k, d] * u[n, d]
    # (A stride-0 sublane-broadcast load, v_ref[:, pl.ds(d, K, stride=0), :],
    # would move the v-row broadcast into the spare vld slot; at 4 MACs total
    # it is noise, so the simpler implicit broadcast is kept.)
    u3 = u[:, :, None]                                     # (N, D, 1)
    v_proj = wv[None, :, 0:1] * v[:, 0:1, :]               # (N, K, HW)
    u_proj = wu[None, :, 0:1] * u3[:, 0:1, :]              # (N, K, 1)
    for d in range(1, D):
        v_proj = v_proj + wv[None, :, d:d + 1] * v[:, d:d + 1, :]
        u_proj = u_proj + wu[None, :, d:d + 1] * u3[:, d:d + 1, :]
    # Bias folded once (bv + bu pre-summed in the packed slab), hoisted out of
    # all per-spatial work.
    u_proj_b = u_proj + bvu[None, :, :]                    # (N, K, 1)

    h = jnp.tanh(v_proj + u_proj_b)                        # (N, K, HW)  (EUP)

    # Scores: K -> 1 sublane (XLU) reduce per batch element.  The Wp conv
    # bias is omitted: softmax is shift-invariant.
    s = jnp.sum(wp[None, :, :] * h, axis=1)                # (N, HW)

    # Softmax over the HW spatial positions (lane axis), all batch rows at once.
    m = jnp.max(s, axis=1, keepdims=True)                  # (N, 1)
    e = jnp.exp(s - m)                                     # (N, HW)
    z = jnp.sum(e, axis=1, keepdims=True)                  # (N, 1)
    # approx=True would use the free EUP slot but costs precision vs the 1e-5
    # check below; exact reciprocal is negligible at this size.
    p = e * pl.reciprocal(z, approx=False)                 # (N, HW)

    # Attention-weighted sum of v over spatial + residual; one dense store.
    v_tilde = jnp.sum(p[:, None, :] * v, axis=2)           # (N, D)
    out_ref[...] = u + v_tilde


def pack_params(wv, bv, wu, bu, wp, bp=None):
    """Pack the six tiny parameter tensors into one (K, 2D+2) slab.

    Layout: [Wv (K,D) | Wu (K,D) | bv+bu (K,1) | wp (K,1)].  One input array
    -> one DMA in the kernel prologue instead of six.
    `bp` (the Wp conv bias) is accepted for parity with the PyTorch module but
    dropped: adding a constant to every spatial score does not change softmax.
    In real (per-timestep) use, call this once and reuse the result.
    """
    del bp
    return jnp.concatenate([wv, wu, bv + bu, wp], axis=1)


@jax.jit
def stacked_attention_packed(v_nchw, u, params):
    """v_nchw: (N, D, H, W) f32; u: (N, D) f32; params: (K, 2D+2) from
    pack_params.  Returns next_u: (N, D)."""
    N, D, H, W = v_nchw.shape
    HW = H * W
    # Free reshape of a contiguous NCHW array (no transpose, no extra HBM
    # pass); a strided/transposed input would make XLA materialize a copy.
    v_flat = v_nchw.reshape(N, D, HW)

    # No grid: whole arrays live in VMEM for a single kernel invocation, so
    # there is no 1-step software pipeline, no double-buffering, and no
    # per-step overhead.  Total resident data here is ~10 KB.
    return pl.pallas_call(
        _stacked_attention_kernel,
        out_shape=jax.ShapeDtypeStruct((N, D), jnp.float32),
        in_specs=[
            pl.BlockSpec(memory_space=pltpu.MemorySpace.VMEM),   # v
            pl.BlockSpec(memory_space=pltpu.MemorySpace.VMEM),   # u
            pl.BlockSpec(memory_space=pltpu.MemorySpace.VMEM),   # packed params
        ],
        out_specs=pl.BlockSpec(memory_space=pltpu.MemorySpace.VMEM),
    )(v_flat, u, params)


def stacked_attention(v_nchw, u, wv, bv, wu, bu, wp, bp=None):
    """Convenience wrapper taking the raw PyTorch-style parameters.

    For repeated invocation (e.g. per RNN/timestep) pack the parameters once
    with pack_params and call stacked_attention_packed directly -- XLA
    dispatch and re-packing dominate the sub-microsecond kernel otherwise.
    """
    return stacked_attention_packed(v_nchw, u, pack_params(wv, bv, wu, bu, wp, bp))


def _reference(v_nchw, u, wv, bv, wu, bu, wp, bp):
    # Pure-JAX reference mirroring the PyTorch forward (bp included here to
    # demonstrate the kernel's bp-drop is output-equivalent).
    N, D, H, W = v_nchw.shape
    v = v_nchw.reshape(N, D, H * W)                              # (N, D, HW)
    v_proj = jnp.einsum("kd,ndh->nkh", wv, v) + bv[None, :, :]   # (N, K, HW)
    u_proj = u @ wu.T + bu[:, 0][None, :]                        # (N, K)
    h = jnp.tanh(v_proj + u_proj[:, :, None])                    # (N, K, HW)
    s = jnp.einsum("k,nkh->nh", wp[:, 0], h) + bp                # (N, HW)
    p = jax.nn.softmax(s, axis=1)                                # (N, HW)
    v_tilde = jnp.einsum("nh,ndh->nd", p, v)                     # (N, D)
    return u + v_tilde


if __name__ == "__main__":
    # N=2 batch, D=4 input_dim, 16x16 spatial, K=32 hidden_dim.
    N, D, H, W, K = 2, 4, 16, 16, 32

    key = jax.random.PRNGKey(0)
    k_v, k_u, k_wv, k_bv, k_wu, k_bu, k_wp, k_bp = jax.random.split(key, 8)

    v = jax.random.normal(k_v, (N, D, H, W), dtype=jnp.float32)
    u = jax.random.normal(k_u, (N, D), dtype=jnp.float32)

    scale = 0.1
    wv = scale * jax.random.normal(k_wv, (K, D), dtype=jnp.float32)  # Conv2d(D,K,1,1) weight
    bv = scale * jax.random.normal(k_bv, (K, 1), dtype=jnp.float32)  # its bias
    wu = scale * jax.random.normal(k_wu, (K, D), dtype=jnp.float32)  # Linear(D,K) weight
    bu = scale * jax.random.normal(k_bu, (K, 1), dtype=jnp.float32)  # its bias
    wp = scale * jax.random.normal(k_wp, (K, 1), dtype=jnp.float32)  # Conv2d(K,1,1,1) weight
    bp = scale * jax.random.normal(k_bp, (), dtype=jnp.float32)      # its bias (no-op under softmax)

    params = pack_params(wv, bv, wu, bu, wp, bp)    # pack once, reuse per step
    out = jax.block_until_ready(stacked_attention_packed(v, u, params))
    ref = jax.block_until_ready(_reference(v, u, wv, bv, wu, bu, wp, bp))
    np.testing.assert_allclose(np.asarray(out), np.asarray(ref), rtol=1e-5, atol=1e-5)

    # TODO(synk): the PyTorch module also stashes `self.attention_maps` as a
    # side attribute; it is not a forward output, so it is not materialized here.
    print("KERNEL_OK")
</pallas_src>

<mosaic_0001>
module attributes {stable_mosaic.version = 11 : i64} {
  func.func @_stacked_attention_kernel(%arg0: memref<2x4x256xf32, #tpu.memory_space<vmem>>, %arg1: memref<2x4xf32, #tpu.memory_space<vmem>>, %arg2: memref<32x10xf32, #tpu.memory_space<vmem>>, %arg3: memref<2x4xf32, #tpu.memory_space<vmem>>) attributes {dimension_semantics = [], scalar_prefetch = 0 : i64, scratch_operands = 0 : i64, tpu.core_type = #tpu.core_type<tc>} {
    %c0 = arith.constant 0 : index
    %c0_0 = arith.constant 0 : index
    %c0_1 = arith.constant 0 : index
    %0 = vector.load %arg0[%c0, %c0_0, %c0_1] : memref<2x4x256xf32, #tpu.memory_space<vmem>>, vector<2x4x256xf32>
    %c0_2 = arith.constant 0 : index
    %c0_3 = arith.constant 0 : index
    %1 = vector.load %arg1[%c0_2, %c0_3] : memref<2x4xf32, #tpu.memory_space<vmem>>, vector<2x4xf32>
    %c0_4 = arith.constant 0 : index
    %c0_5 = arith.constant 0 : index
    %2 = vector.load %arg2[%c0_4, %c0_5] : memref<32x10xf32, #tpu.memory_space<vmem>>, vector<32x10xf32>
    %3 = vector.extract_strided_slice %2 {offsets = [0, 0], sizes = [32, 4], strides = [1, 1]} : vector<32x10xf32> to vector<32x4xf32>
    %4 = vector.extract_strided_slice %2 {offsets = [0, 4], sizes = [32, 4], strides = [1, 1]} : vector<32x10xf32> to vector<32x4xf32>
    %5 = vector.extract_strided_slice %2 {offsets = [0, 8], sizes = [32, 1], strides = [1, 1]} : vector<32x10xf32> to vector<32x1xf32>
    %6 = vector.extract_strided_slice %2 {offsets = [0, 9], sizes = [32, 1], strides = [1, 1]} : vector<32x10xf32> to vector<32x1xf32>
    %7 = vector.shape_cast %1 : vector<2x4xf32> to vector<2x4x1xf32>
    %8 = vector.extract_strided_slice %3 {offsets = [0, 0], sizes = [32, 1], strides = [1, 1]} : vector<32x4xf32> to vector<32x1xf32>
    %9 = vector.shape_cast %8 : vector<32x1xf32> to vector<1x32x1xf32>
    %10 = vector.extract_strided_slice %0 {offsets = [0, 0, 0], sizes = [2, 1, 256], strides = [1, 1, 1]} : vector<2x4x256xf32> to vector<2x1x256xf32>
    %11 = vector.broadcast %9 : vector<1x32x1xf32> to vector<2x32x256xf32>
    %12 = vector.broadcast %10 : vector<2x1x256xf32> to vector<2x32x256xf32>
    %13 = arith.mulf %11, %12 : vector<2x32x256xf32>
    %14 = vector.extract_strided_slice %4 {offsets = [0, 0], sizes = [32, 1], strides = [1, 1]} : vector<32x4xf32> to vector<32x1xf32>
    %15 = vector.shape_cast %14 : vector<32x1xf32> to vector<1x32x1xf32>
    %16 = vector.extract_strided_slice %7 {offsets = [0, 0, 0], sizes = [2, 1, 1], strides = [1, 1, 1]} : vector<2x4x1xf32> to vector<2x1x1xf32>
    %17 = vector.broadcast %15 : vector<1x32x1xf32> to vector<2x32x1xf32>
    %18 = vector.broadcast %16 : vector<2x1x1xf32> to vector<2x32x1xf32>
    %19 = arith.mulf %17, %18 : vector<2x32x1xf32>
    %20 = vector.extract_strided_slice %3 {offsets = [0, 1], sizes = [32, 1], strides = [1, 1]} : vector<32x4xf32> to vector<32x1xf32>
    %21 = vector.shape_cast %20 : vector<32x1xf32> to vector<1x32x1xf32>
    %22 = vector.extract_strided_slice %0 {offsets = [0, 1, 0], sizes = [2, 1, 256], strides = [1, 1, 1]} : vector<2x4x256xf32> to vector<2x1x256xf32>
    %23 = vector.broadcast %21 : vector<1x32x1xf32> to vector<2x32x256xf32>
    %24 = vector.broadcast %22 : vector<2x1x256xf32> to vector<2x32x256xf32>
    %25 = arith.mulf %23, %24 : vector<2x32x256xf32>
    %26 = arith.addf %13, %25 : vector<2x32x256xf32>
    %27 = vector.extract_strided_slice %4 {offsets = [0, 1], sizes = [32, 1], strides = [1, 1]} : vector<32x4xf32> to vector<32x1xf32>
    %28 = vector.shape_cast %27 : vector<32x1xf32> to vector<1x32x1xf32>
    %29 = vector.extract_strided_slice %7 {offsets = [0, 1, 0], sizes = [2, 1, 1], strides = [1, 1, 1]} : vector<2x4x1xf32> to vector<2x1x1xf32>
    %30 = vector.broadcast %28 : vector<1x32x1xf32> to vector<2x32x1xf32>
    %31 = vector.broadcast %29 : vector<2x1x1xf32> to vector<2x32x1xf32>
    %32 = arith.mulf %30, %31 : vector<2x32x1xf32>
    %33 = arith.addf %19, %32 : vector<2x32x1xf32>
    %34 = vector.extract_strided_slice %3 {offsets = [0, 2], sizes = [32, 1], strides = [1, 1]} : vector<32x4xf32> to vector<32x1xf32>
    %35 = vector.shape_cast %34 : vector<32x1xf32> to vector<1x32x1xf32>
    %36 = vector.extract_strided_slice %0 {offsets = [0, 2, 0], sizes = [2, 1, 256], strides = [1, 1, 1]} : vector<2x4x256xf32> to vector<2x1x256xf32>
    %37 = vector.broadcast %35 : vector<1x32x1xf32> to vector<2x32x256xf32>
    %38 = vector.broadcast %36 : vector<2x1x256xf32> to vector<2x32x256xf32>
    %39 = arith.mulf %37, %38 : vector<2x32x256xf32>
    %40 = arith.addf %26, %39 : vector<2x32x256xf32>
    %41 = vector.extract_strided_slice %4 {offsets = [0, 2], sizes = [32, 1], strides = [1, 1]} : vector<32x4xf32> to vector<32x1xf32>
    %42 = vector.shape_cast %41 : vector<32x1xf32> to vector<1x32x1xf32>
    %43 = vector.extract_strided_slice %7 {offsets = [0, 2, 0], sizes = [2, 1, 1], strides = [1, 1, 1]} : vector<2x4x1xf32> to vector<2x1x1xf32>
    %44 = vector.broadcast %42 : vector<1x32x1xf32> to vector<2x32x1xf32>
    %45 = vector.broadcast %43 : vector<2x1x1xf32> to vector<2x32x1xf32>
    %46 = arith.mulf %44, %45 : vector<2x32x1xf32>
    %47 = arith.addf %33, %46 : vector<2x32x1xf32>
    %48 = vector.extract_strided_slice %3 {offsets = [0, 3], sizes = [32, 1], strides = [1, 1]} : vector<32x4xf32> to vector<32x1xf32>
    %49 = vector.shape_cast %48 : vector<32x1xf32> to vector<1x32x1xf32>
    %50 = vector.extract_strided_slice %0 {offsets = [0, 3, 0], sizes = [2, 1, 256], strides = [1, 1, 1]} : vector<2x4x256xf32> to vector<2x1x256xf32>
    %51 = vector.broadcast %49 : vector<1x32x1xf32> to vector<2x32x256xf32>
    %52 = vector.broadcast %50 : vector<2x1x256xf32> to vector<2x32x256xf32>
    %53 = arith.mulf %51, %52 : vector<2x32x256xf32>
    %54 = arith.addf %40, %53 : vector<2x32x256xf32>
    %55 = vector.extract_strided_slice %4 {offsets = [0, 3], sizes = [32, 1], strides = [1, 1]} : vector<32x4xf32> to vector<32x1xf32>
    %56 = vector.shape_cast %55 : vector<32x1xf32> to vector<1x32x1xf32>
    %57 = vector.extract_strided_slice %7 {offsets = [0, 3, 0], sizes = [2, 1, 1], strides = [1, 1, 1]} : vector<2x4x1xf32> to vector<2x1x1xf32>
    %58 = vector.broadcast %56 : vector<1x32x1xf32> to vector<2x32x1xf32>
    %59 = vector.broadcast %57 : vector<2x1x1xf32> to vector<2x32x1xf32>
    %60 = arith.mulf %58, %59 : vector<2x32x1xf32>
    %61 = arith.addf %47, %60 : vector<2x32x1xf32>
    %62 = vector.shape_cast %5 : vector<32x1xf32> to vector<1x32x1xf32>
    %63 = vector.broadcast %62 : vector<1x32x1xf32> to vector<2x32x1xf32>
    %64 = arith.addf %61, %63 : vector<2x32x1xf32>
    %65 = vector.broadcast %64 : vector<2x32x1xf32> to vector<2x32x256xf32>
    %66 = arith.addf %54, %65 : vector<2x32x256xf32>
    %67 = math.tanh %66 : vector<2x32x256xf32>
    %68 = vector.shape_cast %6 : vector<32x1xf32> to vector<1x32x1xf32>
    %69 = vector.broadcast %68 : vector<1x32x1xf32> to vector<2x32x256xf32>
    %70 = arith.mulf %69, %67 : vector<2x32x256xf32>
    %cst = arith.constant dense<0.000000e+00> : vector<2x256xf32>
    %71 = vector.multi_reduction <add>, %70, %cst [1] : vector<2x32x256xf32> to vector<2x256xf32>
    %cst_6 = arith.constant dense<0xFF800000> : vector<2xf32>
    %72 = vector.multi_reduction <maximumf>, %71, %cst_6 [1] : vector<2x256xf32> to vector<2xf32>
    %73 = vector.shape_cast %72 : vector<2xf32> to vector<2x1xf32>
    %74 = vector.broadcast %73 : vector<2x1xf32> to vector<2x256xf32>
    %75 = arith.subf %71, %74 : vector<2x256xf32>
    %76 = math.exp %75 : vector<2x256xf32>
    %cst_7 = arith.constant dense<0.000000e+00> : vector<2xf32>
    %77 = vector.multi_reduction <add>, %76, %cst_7 [1] : vector<2x256xf32> to vector<2xf32>
    %78 = vector.shape_cast %77 : vector<2xf32> to vector<2x1xf32>
    %79 = tpu.reciprocal %78 : vector<2x1xf32> -> vector<2x1xf32>
    %80 = vector.broadcast %79 : vector<2x1xf32> to vector<2x256xf32>
    %81 = arith.mulf %76, %80 : vector<2x256xf32>
    %82 = vector.shape_cast %81 : vector<2x256xf32> to vector<2x1x256xf32>
    %83 = vector.broadcast %82 : vector<2x1x256xf32> to vector<2x4x256xf32>
    %84 = arith.mulf %83, %0 : vector<2x4x256xf32>
    %cst_8 = arith.constant dense<0.000000e+00> : vector<2x4xf32>
    %85 = vector.multi_reduction <add>, %84, %cst_8 [2] : vector<2x4x256xf32> to vector<2x4xf32>
    %86 = arith.addf %1, %85 : vector<2x4xf32>
    %c0_9 = arith.constant 0 : index
    %c0_10 = arith.constant 0 : index
    %87 = vector.load %arg3[%c0_9, %c0_10] : memref<2x4xf32, #tpu.memory_space<vmem>>, vector<2x4xf32>
    tpu.vector_store %arg3[%c0_9, %c0_10], %86 {strides = array<i32>} : memref<2x4xf32, #tpu.memory_space<vmem>>, vector<2x4xf32>,
    return
  }
}

</mosaic_0001>

<bundles_post_ra>
// kernel: stacked_attention_packed.1
= control target key start
LH: loop header
LB: loop body
LE: loop exit
PB: predicated region body
PF: predicated region fallthrough
CT: control target
= control target key end

     0   :  { %v1197_v0 = vlaneseq  ;;  %s813_s14 = smov 124   ;;  %v814_v4 = vmov 0   ;;  %s1193_s0 = inlined_call_operand.vmem [shape: f32[2,4,256], index: 0, kind: input, shape index: {}]   ;;  %s1194_s1 = inlined_call_operand.vmem [shape: f32[2,4], index: 1, kind: input, shape index: {}]   ;;  %s1195_s2 = inlined_call_operand.vmem [shape: f32[32,10], index: 2, kind: input, shape index: {}]   ;;  %s1196_s3 = inlined_call_operand.hbm [shape: f32[2,4], index: 3, kind: output, shape index: {}]  }
   0x1   :  { %v847_v1 = vld [vmem:[%s1195_s2 + $0x8] sm:$0xff]  ;;  %v853_v2 = vld [vmem:[%s1195_s2 + $0x18] sm:$0xff]  ;;  %724 = vset.pattern.permute.xlu1 %v814_v4 }
   0x2   :  { %428 = vrot.lane.b32.xlu1 %v847_v1, %s813_s14  ;;  %v24_v3 = vshrl.u32 %v1197_v0, 7  ;;  %432 = vrot.lane.b32.xlu2 %v853_v2, %s813_s14 }
   0x3   :  { %8 = vsyncpa [#allocation3], 0  ;;  %v815_v5 = vmov 1   ;;  %v17_v6 = vld [vmem:[%s1194_s1] sm:$0x3]  ;;  %v863_v7 = vld [vmem:[%s1195_s2 + $0x10] sm:$0xff] }
   0x4   :  { %725 = vset.pattern.permute.xlu2 %v815_v5  ;;  %722 = vset.pattern.permute.xlu0 %v24_v3  ;;  %v22_v8 = vperm.slane %v17_v6, 0  ;;  %v869_v9 = vld [vmem:[%s1195_s2] sm:$0xff]  ;;  %v29_v10 = vperm.slane %v17_v6, 1  ;;  %v1198_v11 = vmov 2   ;;  %s817_s2 = smov 127   ;;  %s818_s23 = smov 126  }
   0x5   :  { %v1199_v33 = vmov 3   ;;  %s820_s24 = smov 125   ;;  %v940_v38 = vld [vmem:[%s1193_s0] sm:$0xff]  ;;  %v948_v41 = vld [vmem:[%s1193_s0 + $0x8] sm:$0xff]  ;;  %vm590_vm0 = vcmask 1041409   ;;  %vm595_vm1 = vcmask 1041408  }
   0x6   :  { %658 = vst [vmem:[#allocation1] ss:$2 sm:$0xff] %v940_v38  ;;  %v58_v46 = vperm.slane %v940_v38, 0  ;;  %v59_v47 = vperm.slane %v940_v38, 4  ;;  %v60_v48 = vperm.slane %v948_v41, 0  ;;  %v61_v49 = vperm.slane %v948_v41, 4 }
   0x7   :  { %662 = vst [vmem:[#allocation1 + $0x10] ss:$2 sm:$0xff] %v948_v41  ;;  %v112_v50 = vperm.slane %v940_v38, 1  ;;  %v113_v51 = vperm.slane %v940_v38, 5  ;;  %v114_v52 = vperm.slane %v948_v41, 1  ;;  %v115_v53 = vperm.slane %v948_v41, 5 }
   0x8   :  { %v972_v56 = vperm.slane %v58_v46, 0  ;;  %v974_v57 = vperm.slane %v59_v47, 0  ;;  %v976_v58 = vperm.slane %v60_v48, 0  ;;  %v978_v59 = vperm.slane %v61_v49, 0  ;;  %s823_s0 = smov [#allocation2]   ;;  %s702_s5 = sshll.u32 %s1196_s3, 4  ;;  %s703_s5 = int_to_ptr.hbm [resolvable:$true] %s702_s5 }
   0x9   :  { %v980_v60 = vperm.slane %v112_v50, 1  ;;  %v982_v61 = vperm.slane %v113_v51, 1  ;;  %v984_v62 = vperm.slane %v114_v52, 1  ;;  %v986_v63 = vperm.slane %v115_v53, 1  ;;  %s700_s29 = sshll.u32 %s823_s0, 4  ;;  %s701_s29 = int_to_ptr.vmem [resolvable:$true] %s700_s29 }
   0xa   :  { %430 = vrot.lane.b32.xlu1 %v863_v7, %s813_s14  ;;  %97 = vperm.xlu2 %725, %v869_v9   ;;  %vm673_vm6 = vcmask 1043456   ;;  %vm693_vm7 = vcmask 25600  }
   0xc   :  { %27 = vperm.xlu0 %722, %v22_v8  }
  0x12   :  { %43 = vperm.xlu1 %724, %v847_v1   ;;  %727 = vset.pattern.permute.xlu2 %v814_v4 }
  0x13   :  { %48 = vperm.xlu2 %727, %v863_v7  }
  0x14   :  { %34 = vperm.xlu0 %722, %v29_v10  }
  0x1a   :  { %726 = vset.pattern.permute.xlu1 %v815_v5 }
  0x1b   :  { %101 = vperm.xlu1 %726, %v847_v1   ;;  %730 = vset.pattern.permute.xlu2 %v1198_v11 }
  0x1c   :  { %426 = vrot.lane.b32.xlu0 %v869_v9, %s813_s14  ;;  %211 = vperm.xlu2 %730, %v847_v1  }
  0x1d   :  { %723 = vset.pattern.permute.xlu0 %v814_v4 }
  0x23   :  { %729 = vset.pattern.permute.xlu1 %v1198_v11 }
  0x24   :  { %207 = vperm.xlu1 %729, %v869_v9   ;;  %38 = vperm.xlu0 %723, %v869_v9  }
  0x25   :  { %732 = vset.pattern.permute.xlu2 %v815_v5 }
  0x26   :  { %109 = vperm.xlu2 %732, %v853_v2  }
  0x2c   :  { %731 = vset.pattern.permute.xlu1 %v814_v4  ;;  %728 = vset.pattern.permute.xlu0 %v815_v5 }
  0x2d   :  { %53 = vperm.xlu1 %731, %v853_v2   ;;  %105 = vperm.xlu0 %728, %v863_v7  }
  0x2e   :  { %735 = vset.pattern.permute.xlu2 %v1199_v33 }
  0x35   :  { %733 = vset.pattern.permute.xlu0 %v1198_v11  ;;  %734 = vset.pattern.permute.xlu1 %v1199_v33 }
  0x5c   :  { %v921_v30 = vpop.permute.xlu2 %432 }
  0x64   :  { %v98_v39 = vpop.permute.xlu2 %97 }
  0x6d   :  { %v970_v55 = vpop.permute.xlu2 %48 }
  0x74   :  { %v911_v25 = vpop.permute.xlu1 %428 }
  0x7c   :  { %v923_v31 = vpop.permute.xlu1 %430 }
  0x7e   :  { %v885_v12 = vpop.permute.xlu0 %27 }
  0x7f   :  { %v156_v13 = vperm.slane %v885_v12, 1  ;;  %v893_v16 = vperm.slane %v885_v12, 2  ;;  %v943_v40 = vperm.slane %v885_v12, 3 }
  0x81   :  { %v160_v14 = vmul.f32 %v156_v13, %v863_v7  ;;  %v158_v15 = vmul.f32 %v156_v13, %v869_v9  ;;  %v269_v19 = vmul.f32 %v893_v16, %v847_v1  ;;  %v159_v20 = vmul.f32 %v156_v13, %v847_v1 }
  0x82   :  { %v161_v22 = vmul.f32 %v156_v13, %v853_v2  ;;  %v268_v29 = vmul.f32 %v893_v16, %v869_v9  ;;  %v378_v44 = vmul.f32 %v943_v40, %v869_v9  ;;  %v270_v45 = vmul.f32 %v893_v16, %v863_v7 }
  0x83   :  { %178 = vrot.lane.b32.xlu0 %v160_v14, %s817_s2  ;;  %174 = vrot.lane.b32.xlu1 %v158_v15, %s817_s2  ;;  %v379_v3 = vmul.f32 %v943_v40, %v847_v1  ;;  %v380_v4 = vmul.f32 %v943_v40, %v863_v7  ;;  %v271_v8 = vmul.f32 %v893_v16, %v853_v2 }
  0x84   :  { %v44_v37 = vpop.permute.xlu1 %43  ;;  %v133_v16 = vmul.f32 %v986_v63, %v98_v39 }
  0x85   :  { %v72_v10 = vmul.f32 %v972_v56, %v44_v37  ;;  %v73_v13 = vmul.f32 %v974_v57, %v44_v37  ;;  %v80_v14 = vmul.f32 %v976_v58, %v44_v37  ;;  %v81_v15 = vmul.f32 %v978_v59, %v44_v37 }
  0x86   :  { %v895_v17 = vpop.permute.xlu0 %34 }
  0x87   :  { %v157_v18 = vperm.slane %v895_v17, 1  ;;  %v267_v26 = vperm.slane %v895_v17, 2  ;;  %v926_v32 = vperm.slane %v895_v17, 3 }
  0x89   :  { %v162_v21 = vmul.f32 %v157_v18, %v869_v9  ;;  %v164_v23 = vmul.f32 %v157_v18, %v863_v7  ;;  %v163_v24 = vmul.f32 %v157_v18, %v847_v1  ;;  %v274_v27 = vmul.f32 %v267_v26, %v863_v7 }
  0x8a   :  { %v272_v28 = vmul.f32 %v267_v26, %v869_v9  ;;  %v382_v34 = vmul.f32 %v926_v32, %v869_v9  ;;  %v165_v35 = vmul.f32 %v157_v18, %v853_v2  ;;  %v273_v36 = vmul.f32 %v267_v26, %v847_v1 }
  0x8b   :  { %286 = vrot.lane.b32.xlu0 %v269_v19, %s818_s23  ;;  %176 = vrot.lane.b32.xlu1 %v159_v20, %s817_s2  ;;  %v275_v43 = vmul.f32 %v267_v26, %v853_v2  ;;  %v385_v5 = vmul.f32 %v926_v32, %v853_v2  ;;  %v383_v6 = vmul.f32 %v926_v32, %v847_v1  ;;  %v225_v26 = vperm.slane %v948_v41, 6 }
  0x8c   :  { %182 = vrot.lane.b32.xlu2 %v162_v21, %s817_s2  ;;  %v124_v18 = vmul.f32 %v980_v60, %v98_v39  ;;  %v125_v20 = vmul.f32 %v982_v61, %v98_v39  ;;  %v132_v21 = vmul.f32 %v984_v62, %v98_v39 }
  0x8d   :  { %v102_v54 = vpop.permute.xlu1 %101 }
  0x8e   :  { %v952_v42 = vpop.permute.xlu0 %426 }
  0x93   :  { %180 = vrot.lane.b32.xlu0 %v161_v22, %s817_s2  ;;  %186 = vrot.lane.b32.xlu1 %v164_v23, %s817_s2  ;;  %v222_v22 = vperm.slane %v940_v38, 2  ;;  %v223_v23 = vperm.slane %v940_v38, 6 }
  0x94   :  { %184 = vrot.lane.b32.xlu2 %v163_v24, %s817_s2  ;;  %v224_v24 = vperm.slane %v948_v41, 2 }
  0x95   :  { %v1019_v37 = vperm.slane %v223_v23, 2 }
  0x96   :  { %v39_v19 = vpop.permute.xlu0 %38  ;;  %v1021_v39 = vperm.slane %v224_v24, 2 }
  0x97   :  { %1205 = vst [vmem:[#allocation6_spill] sm:$0xff] %v1019_v37  ;;  %v70_v46 = vmul.f32 %v972_v56, %v39_v19  ;;  %v71_v47 = vmul.f32 %v974_v57, %v39_v19  ;;  %v78_v48 = vmul.f32 %v976_v58, %v39_v19  ;;  %v79_v49 = vmul.f32 %v978_v59, %v39_v19 }
  0x99   :  { %v140_v19 = vadd.f32 %v124_v18, %v70_v46  ;;  %v148_v0 = vadd.f32 %v132_v21, %v78_v48 }
  0x9b   :  { %296 = vrot.lane.b32.xlu0 %v274_v27, %s818_s23  ;;  %292 = vrot.lane.b32.xlu1 %v272_v28, %s818_s23  ;;  %v126_v27 = vmul.f32 %v980_v60, %v102_v54  ;;  %v127_v28 = vmul.f32 %v982_v61, %v102_v54 }
  0x9c   :  { %284 = vrot.lane.b32.xlu2 %v268_v29, %s818_s23  ;;  %v134_v29 = vmul.f32 %v984_v62, %v102_v54 }
  0x9e   :  { %v150_v23 = vadd.f32 %v134_v29, %v80_v14  ;;  %v83_v14 = vmul.f32 %v978_v59, %v970_v55  ;;  %v149_v29 = vadd.f32 %v133_v16, %v79_v49 }
  0x9f   :  { %v106_v11 = vpop.permute.xlu0 %105 }
  0xa0   :  { %v129_v18 = vmul.f32 %v982_v61, %v106_v11  ;;  %v137_v21 = vmul.f32 %v986_v63, %v106_v11 }
  0xa2   :  { %v1072_v46 = vadd.f32 %v137_v21, %v83_v14 }
  0xa3   :  { %402 = vrot.lane.b32.xlu0 %v382_v34, %s820_s24  ;;  %188 = vrot.lane.b32.xlu1 %v165_v35, %s817_s2  ;;  %v135_v34 = vmul.f32 %v986_v63, %v102_v54  ;;  %v208_v35 = vpop.permute.xlu1 %207 }
  0xa4   :  { %294 = vrot.lane.b32.xlu2 %v273_v36, %s818_s23  ;;  %v1017_v36 = vperm.slane %v222_v22, 2  ;;  %v235_v51 = vmul.f32 %v1019_v37, %v208_v35  ;;  %v242_v52 = vmul.f32 %v1021_v39, %v208_v35  ;;  %v143_v22 = vadd.f32 %v127_v28, %v73_v13 }
  0xa5   :  { %v151_v24 = vadd.f32 %v135_v34, %v81_v15  ;;  %v75_v13 = vmul.f32 %v974_v57, %v970_v55  ;;  %v128_v15 = vmul.f32 %v980_v60, %v106_v11 }
  0xa6   :  { %1204 = vst [vmem:[#allocation5_spill] sm:$0xff] %v1017_v36  ;;  %v234_v50 = vmul.f32 %v1017_v36, %v208_v35  ;;  %v1064_v34 = vadd.f32 %v242_v52, %v148_v0  ;;  %v381_v0 = vmul.f32 %v943_v40, %v853_v2 }
  0xa7   :  { %v1076_v48 = vadd.f32 %v129_v18, %v75_v13 }
  0xab   :  { %298 = vrot.lane.b32.xlu0 %v275_v43, %s818_s23  ;;  %394 = vrot.lane.b32.xlu1 %v378_v44, %s820_s24  ;;  %v1023_v43 = vperm.slane %v225_v26, 2  ;;  %v212_v44 = vpop.permute.xlu2 %211  ;;  %v141_v26 = vadd.f32 %v125_v20, %v71_v47  ;;  %v136_v20 = vmul.f32 %v984_v62, %v106_v11  ;;  %v1206_v11 = vmov 3   ;;  %v54_v16 = vpop.permute.xlu1 %53 }
  0xac   :  { %288 = vrot.lane.b32.xlu2 %v270_v45, %s818_s23  ;;  %v74_v45 = vmul.f32 %v972_v56, %v970_v55  ;;  %v236_v53 = vmul.f32 %v1017_v36, %v212_v44  ;;  %v237_v54 = vmul.f32 %v1019_v37, %v212_v44  ;;  %v77_v40 = vmul.f32 %v974_v57, %v54_v16 }
  0xad   :  { %v1062_v28 = vadd.f32 %v235_v51, %v141_v26 }
  0xae   :  { %v1043_v37 = vadd.f32 %v237_v54, %v143_v22  ;;  %v1074_v47 = vadd.f32 %v128_v15, %v74_v45  ;;  %v84_v54 = vmul.f32 %v976_v58, %v54_v16 }
  0xb3   :  { %408 = vrot.lane.b32.xlu0 %v385_v5, %s820_s24  ;;  %404 = vrot.lane.b32.xlu1 %v383_v6, %s820_s24  ;;  %v245_v5 = vmul.f32 %v1023_v43, %v212_v44  ;;  %v142_v6 = vadd.f32 %v126_v27, %v72_v10  ;;  %v1060_v27 = vadd.f32 %v234_v50, %v140_v19  ;;  %v110_v45 = vpop.permute.xlu2 %109  ;;  %v86_v19 = vperm.slane %v885_v12, 0 }
  0xb4   :  { %396 = vrot.lane.b32.xlu2 %v379_v3, %s820_s24  ;;  %v244_v3 = vmul.f32 %v1021_v39, %v212_v44  ;;  %v130_v49 = vmul.f32 %v980_v60, %v110_v45  ;;  %v131_v50 = vmul.f32 %v982_v61, %v110_v45  ;;  %v138_v51 = vmul.f32 %v984_v62, %v110_v45 }
  0xb5   :  { %v1041_v33 = vadd.f32 %v236_v53, %v142_v6  ;;  %v1047_v10 = vadd.f32 %v245_v5, %v151_v24  ;;  %v139_v52 = vmul.f32 %v986_v63, %v110_v45  ;;  %v76_v53 = vmul.f32 %v972_v56, %v54_v16 }
  0xb6   :  { %v1045_v36 = vadd.f32 %v244_v3, %v150_v23  ;;  %v85_v3 = vmul.f32 %v978_v59, %v54_v16  ;;  %v1098_v6 = vadd.f32 %v131_v50, %v77_v40  ;;  %v1100_v60 = vadd.f32 %v138_v51, %v84_v54 }
  0xb7   :  { %v1096_v5 = vadd.f32 %v130_v49, %v76_v53  ;;  %v821_v63 = vmov 4   ;;  %v87_v12 = vperm.slane %v895_v17, 0  ;;  %v91_v17 = vmul.f32 %v86_v19, %v853_v2 }
  0xb8   :  { %v1102_v61 = vadd.f32 %v139_v52, %v85_v3 }
  0xb9   :  { %v92_v50 = vmul.f32 %v87_v12, %v869_v9  ;;  %v93_v54 = vmul.f32 %v87_v12, %v847_v1 }
  0xbb   :  { %215 = vperm.xlu0 %733, %v863_v7   ;;  %398 = vrot.lane.b32.xlu1 %v380_v4, %s820_s24  ;;  %v82_v4 = vmul.f32 %v976_v58, %v970_v55  ;;  %v384_v55 = vmul.f32 %v926_v32, %v863_v7  ;;  %v1207_v32 = vmov 2  }
  0xbc   :  { %290 = vrot.lane.b32.xlu2 %v271_v8, %s818_s23  ;;  %v243_v8 = vmul.f32 %v1023_v43, %v208_v35 }
  0xbd   :  { %v1070_v35 = vadd.f32 %v136_v20, %v82_v4  ;;  %v89_v4 = vmul.f32 %v86_v19, %v847_v1 }
  0xbe   :  { %v1068_v44 = vadd.f32 %v243_v8, %v149_v29 }
  0xc3   :  { %317 = vperm.xlu1 %734, %v869_v9   ;;  %737 = vset.pattern.permute.xlu0 %v1206_v11 }
  0xc4   :  { %406 = vrot.lane.b32.xlu2 %v384_v55, %s820_s24  ;;  %329 = vperm.xlu0 %737, %v853_v2  }
  0xcb   :  { %736 = vset.pattern.permute.xlu1 %v1207_v32 }
  0xcc   :  { %400 = vrot.lane.b32.xlu2 %v381_v0, %s820_s24  ;;  %219 = vperm.xlu1 %736, %v853_v2   ;;  %v88_v0 = vmul.f32 %v86_v19, %v869_v9 }
  0xcd   :  { %740 = vset.pattern.permute.xlu0 %v821_v63 }
  0xd4   :  { %321 = vperm.xlu2 %735, %v847_v1   ;;  %738 = vset.pattern.permute.xlu1 %v821_v63 }
  0xdc   :  { %325 = vperm.xlu2 %735, %v863_v7  }
  0xe4   :  { %739 = vset.pattern.permute.xlu2 %v821_v63 }
  0xe6   :  { %v183_v62 = vpop.permute.xlu2 %182 }
  0xe7   :  { %v202_v40 = vadd.f32 %v183_v62, %v92_v50 }
  0xee   :  { %v185_v56 = vpop.permute.xlu2 %184 }
  0xef   :  { %v203_v63 = vadd.f32 %v185_v56, %v93_v54 }
  0xf5   :  { %v175_v57 = vpop.permute.xlu1 %174  ;;  %v179_v59 = vpop.permute.xlu0 %178 }
  0xf6   :  { %v285_v58 = vpop.permute.xlu2 %284  ;;  %v198_v16 = vadd.f32 %v175_v57, %v88_v0 }
  0xf8   :  { %v308_v45 = vadd.f32 %v285_v58, %v198_v16 }
  0xfd   :  { %v177_v22 = vpop.permute.xlu1 %176  ;;  %v287_v24 = vpop.permute.xlu0 %286 }
  0xfe   :  { %v295_v23 = vpop.permute.xlu2 %294  ;;  %v199_v14 = vadd.f32 %v177_v22, %v89_v4 }
 0x100   :  { %v309_v15 = vadd.f32 %v287_v24, %v199_v14  ;;  %v313_v24 = vadd.f32 %v295_v23, %v203_v63  ;;  %v94_v14 = vmul.f32 %v87_v12, %v863_v7  ;;  %v334_v63 = vperm.slane %v948_v41, 3 }
 0x105   :  { %v187_v26 = vpop.permute.xlu1 %186  ;;  %v181_v8 = vpop.permute.xlu0 %180 }
 0x106   :  { %v289_v13 = vpop.permute.xlu2 %288  ;;  %v204_v0 = vadd.f32 %v187_v26, %v94_v14 }
 0x10d   :  { %v293_v18 = vpop.permute.xlu1 %292  ;;  %v297_v55 = vpop.permute.xlu0 %296 }
 0x10e   :  { %v397_v20 = vpop.permute.xlu2 %396  ;;  %v312_v22 = vadd.f32 %v293_v18, %v202_v40  ;;  %v314_v23 = vadd.f32 %v297_v55, %v204_v0  ;;  %v1209_v0 = vld [vmem:[#allocation6_spill] sm:$0xff] }
 0x10f   :  { %v419_v21 = vadd.f32 %v397_v20, %v309_v15  ;;  %v90_v15 = vmul.f32 %v86_v19, %v863_v7  ;;  %v201_v20 = vadd.f32 %v181_v8, %v91_v17  ;;  %v95_v19 = vmul.f32 %v87_v12, %v853_v2 }
 0x111   :  { %v439_v29 = vadd.f32 %v911_v25, %v419_v21  ;;  %v200_v18 = vadd.f32 %v179_v59, %v90_v15  ;;  %v1208_v15 = vld [vmem:[#allocation5_spill] sm:$0xff] }
 0x113   :  { %453 = vperm.xlu2 %739, %v439_v29  }
 0x115   :  { %v189_v11 = vpop.permute.xlu1 %188  ;;  %v403_v51 = vpop.permute.xlu0 %402 }
 0x116   :  { %v291_v32 = vpop.permute.xlu2 %290  ;;  %v422_v4 = vadd.f32 %v403_v51, %v312_v22  ;;  %v205_v40 = vadd.f32 %v189_v11, %v95_v19 }
 0x117   :  { %v311_v16 = vadd.f32 %v291_v32, %v201_v20  ;;  %v822_v32 = vmov 9  }
 0x118   :  { %v442_v62 = vadd.f32 %v952_v42, %v422_v4  ;;  %v1133_v4 = vperm.slane %v334_v63, 3 }
 0x11d   :  { %v395_v49 = vpop.permute.xlu1 %394  ;;  %v299_v21 = vpop.permute.xlu0 %298 }
 0x11e   :  { %v418_v52 = vadd.f32 %v395_v49, %v308_v45  ;;  %v407_v53 = vpop.permute.xlu2 %406  ;;  %v310_v45 = vadd.f32 %v289_v13, %v200_v18  ;;  %v315_v59 = vadd.f32 %v299_v21, %v205_v40 }
 0x11f   :  { %v424_v50 = vadd.f32 %v407_v53, %v314_v23 }
 0x120   :  { %v438_v3 = vadd.f32 %v952_v42, %v418_v52 }
 0x122   :  { %448 = vperm.xlu1 %738, %v438_v3   ;;  %v333_v3 = vperm.slane %v940_v38, 7 }
 0x125   :  { %v405_v57 = vpop.permute.xlu1 %404  ;;  %v409_v26 = vpop.permute.xlu0 %408 }
 0x126   :  { %v423_v58 = vadd.f32 %v405_v57, %v313_v24  ;;  %v401_v56 = vpop.permute.xlu2 %400  ;;  %v425_v55 = vadd.f32 %v409_v26, %v315_v59 }
 0x127   :  { %v421_v49 = vadd.f32 %v401_v56, %v311_v16 }
 0x128   :  { %v443_v29 = vadd.f32 %v911_v25, %v423_v58  ;;  %v444_v25 = vadd.f32 %v923_v31, %v424_v50  ;;  %v445_v13 = vadd.f32 %v921_v30, %v425_v55 }
 0x129   :  { %v441_v8 = vadd.f32 %v921_v30, %v421_v49  ;;  %v332_v30 = vperm.slane %v940_v38, 3 }
 0x12a   :  { %473 = vperm.xlu2 %739, %v443_v29   ;;  %468 = vperm.xlu1 %738, %v442_v62  }
 0x12d   :  { %v399_v51 = vpop.permute.xlu1 %398  ;;  %v216_v22 = vpop.permute.xlu0 %215 }
 0x12e   :  { %v420_v52 = vadd.f32 %v399_v51, %v310_v45  ;;  %v246_v58 = vmul.f32 %v1021_v39, %v216_v22  ;;  %v238_v20 = vmul.f32 %v1208_v15, %v216_v22  ;;  %v247_v21 = vmul.f32 %v1023_v43, %v216_v22 }
 0x12f   :  { %v239_v56 = vmul.f32 %v1209_v0, %v216_v22 }
 0x130   :  { %v440_v42 = vadd.f32 %v923_v31, %v420_v52  ;;  %v322_v31 = vpop.permute.xlu2 %321  ;;  %v262_v19 = vadd.f32 %v246_v58, %v1070_v35  ;;  %v263_v55 = vadd.f32 %v247_v21, %v1072_v46 }
 0x132   :  { %458 = vperm.xlu0 %740, %v440_v42   ;;  %463 = vperm.xlu2 %739, %v441_v8  }
 0x133   :  { %478 = vperm.xlu1 %738, %v444_v25   ;;  %v254_v25 = vadd.f32 %v238_v20, %v1074_v47 }
 0x135   :  { %v318_v11 = vpop.permute.xlu1 %317 }
 0x136   :  { %v352_v29 = vmul.f32 %v1133_v4, %v318_v11  ;;  %v330_v49 = vpop.permute.xlu0 %329 }
 0x138   :  { %v1127_v12 = vpop.permute.xlu2 %325  ;;  %v368_v59 = vadd.f32 %v352_v29, %v1064_v34 }
 0x13a   :  { %742 = vset.pattern.permute.xlu0 %v822_v32  ;;  %741 = vset.pattern.permute.xlu2 %v822_v32 }
 0x13b   :  { %483 = vperm.xlu1 %738, %v445_v13   ;;  %523 = vperm.xlu0 %742, %v847_v1   ;;  %v340_v1 = vperm.slane %v332_v30, 3  ;;  %v255_v30 = vadd.f32 %v239_v56, %v1076_v48 }
 0x13c   :  { %519 = vperm.xlu2 %741, %v869_v9   ;;  %v335_v9 = vperm.slane %v948_v41, 7  ;;  %v354_v41 = vmul.f32 %v1133_v4, %v322_v31 }
 0x13d   :  { %v344_v14 = vmul.f32 %v340_v1, %v318_v11  ;;  %v348_v34 = vmul.f32 %v340_v1, %v1127_v12 }
 0x13e   :  { %v220_v53 = vpop.permute.xlu1 %219  ;;  %v1135_v17 = vperm.slane %v335_v9, 3 }
 0x13f   :  { %v240_v18 = vmul.f32 %v1208_v15, %v220_v53  ;;  %v241_v45 = vmul.f32 %v1209_v0, %v220_v53  ;;  %v360_v50 = vadd.f32 %v344_v14, %v1060_v27 }
 0x140   :  { %v355_v23 = vmul.f32 %v1135_v17, %v322_v31  ;;  %v353_v52 = vmul.f32 %v1135_v17, %v318_v11 }
 0x141   :  { %v256_v13 = vadd.f32 %v240_v18, %v1096_v5  ;;  %v357_v5 = vmul.f32 %v1135_v17, %v1127_v12 }
 0x142   :  { %v371_v27 = vadd.f32 %v355_v23, %v1047_v10  ;;  %v356_v10 = vmul.f32 %v1133_v4, %v1127_v12 }
 0x143   :  { %743 = vset.pattern.permute.xlu1 %v822_v32  ;;  %v350_v32 = vmul.f32 %v340_v1, %v330_v49  ;;  %v373_v15 = vadd.f32 %v357_v5, %v263_v55 }
 0x144   :  { %531 = vperm.xlu2 %741, %v853_v2   ;;  %527 = vperm.xlu1 %743, %v863_v7   ;;  %v341_v2 = vperm.slane %v333_v3, 3  ;;  %v346_v7 = vmul.f32 %v340_v1, %v322_v31  ;;  %v372_v14 = vadd.f32 %v356_v10, %v262_v19 }
 0x146   :  { %v347_v38 = vmul.f32 %v341_v2, %v322_v31  ;;  %v345_v62 = vmul.f32 %v341_v2, %v318_v11  ;;  %v362_v16 = vadd.f32 %v346_v7, %v1041_v33  ;;  %v370_v33 = vadd.f32 %v354_v41, %v1045_v36 }
 0x147   :  { %v351_v31 = vmul.f32 %v341_v2, %v330_v49  ;;  %v364_v7 = vadd.f32 %v348_v34, %v254_v25 }
 0x148   :  { %v363_v8 = vadd.f32 %v347_v38, %v1043_v37  ;;  %v361_v40 = vadd.f32 %v345_v62, %v1062_v28  ;;  %v257_v37 = vadd.f32 %v241_v45, %v1098_v6  ;;  %v369_v28 = vadd.f32 %v353_v52, %v1068_v44 }
 0x149   :  { %v248_v6 = vmul.f32 %v1021_v39, %v220_v53  ;;  %v366_v44 = vadd.f32 %v350_v32, %v256_v13  ;;  %v358_v38 = vmul.f32 %v1133_v4, %v330_v49 }
 0x14a   :  { %v367_v9 = vadd.f32 %v351_v31, %v257_v37 }
 0x14b   :  { %v264_v62 = vadd.f32 %v248_v6, %v1100_v60 }
 0x16d   :  { %v454_v54 = vpop.permute.xlu2 %453 }
 0x16e   :  { %v488_v42 = vadd.f32 %v454_v54, %v362_v16  ;;  %v489_v47 = vadd.f32 %v454_v54, %v363_v8  ;;  %v249_v54 = vmul.f32 %v1023_v43, %v220_v53  ;;  %v359_v43 = vmul.f32 %v1135_v17, %v330_v49 }
 0x16f   :  { %v374_v17 = vadd.f32 %v358_v38, %v264_v62 }
 0x170   :  { %744 = vtanh.f32 %v488_v42  ;;  %v265_v21 = vadd.f32 %v249_v54, %v1102_v61 }
 0x172   :  { %v375_v16 = vadd.f32 %v359_v43, %v265_v21 }
 0x176   :  { %v745_v39 = vpop.eup %744 }
 0x184   :  { %v474_v57 = vpop.permute.xlu2 %473 }
 0x185   :  { %v496_v3 = vadd.f32 %v474_v57, %v370_v33  ;;  %v497_v63 = vadd.f32 %v474_v57, %v371_v27 }
 0x18c   :  { %v464_v36 = vpop.permute.xlu2 %463 }
 0x18d   :  { %v492_v1 = vadd.f32 %v464_v36, %v366_v44  ;;  %v493_v58 = vadd.f32 %v464_v36, %v367_v9 }
 0x194   :  { %v449_v24 = vpop.permute.xlu1 %448 }
 0x195   :  { %v486_v26 = vadd.f32 %v449_v24, %v360_v50  ;;  %v487_v35 = vadd.f32 %v449_v24, %v361_v40  ;;  %v349_v24 = vmul.f32 %v341_v2, %v1127_v12 }
 0x196   :  { %v520_v56 = vpop.permute.xlu2 %519 }
 0x197   :  { %746 = vtanh.f32 %v486_v26  ;;  %v365_v41 = vadd.f32 %v349_v24, %v255_v30 }
 0x198   :  { %748 = vtanh.f32 %v487_v35 }
 0x19c   :  { %v469_v51 = vpop.permute.xlu1 %468 }
 0x19d   :  { %v494_v11 = vadd.f32 %v469_v51, %v368_v59  ;;  %v495_v46 = vadd.f32 %v469_v51, %v369_v28  ;;  %v747_v53 = vpop.eup %746 }
 0x19e   :  { %v749_v12 = vpop.eup %748  ;;  %v534_v45 = vmul.f32 %v747_v53, %v520_v56 }
 0x19f   :  { %750 = vtanh.f32 %v494_v11  ;;  %v535_v49 = vmul.f32 %v749_v12, %v520_v56  ;;  %v532_v11 = vpop.permute.xlu2 %531 }
 0x1a0   :  { %752 = vtanh.f32 %v489_v47 }
 0x1a1   :  { %754 = vtanh.f32 %v495_v46 }
 0x1a2   :  { %756 = vtanh.f32 %v496_v3 }
 0x1a3   :  { %758 = vtanh.f32 %v497_v63 }
 0x1a4   :  { %v459_v48 = vpop.permute.xlu0 %458  ;;  %760 = vtanh.f32 %v492_v1 }
 0x1a5   :  { %v479_v22 = vpop.permute.xlu1 %478  ;;  %v490_v20 = vadd.f32 %v459_v48, %v364_v7  ;;  %v751_v29 = vpop.eup %750  ;;  %762 = vtanh.f32 %v493_v58  ;;  %v491_v18 = vadd.f32 %v459_v48, %v365_v41 }
 0x1a6   :  { %v498_v57 = vadd.f32 %v479_v22, %v372_v14  ;;  %v499_v2 = vadd.f32 %v479_v22, %v373_v15  ;;  %v753_v0 = vpop.eup %752  ;;  %v542_v60 = vmul.f32 %v751_v29, %v520_v56 }
 0x1a7   :  { %764 = vtanh.f32 %v490_v20  ;;  %v755_v4 = vpop.eup %754 }
 0x1a8   :  { %766 = vtanh.f32 %v498_v57  ;;  %v757_v23 = vpop.eup %756  ;;  %v543_v25 = vmul.f32 %v755_v4, %v520_v56 }
 0x1a9   :  { %768 = vtanh.f32 %v499_v2  ;;  %v759_v51 = vpop.eup %758 }
 0x1aa   :  { %v761_v40 = vpop.eup %760  ;;  %770 = vtanh.f32 %v491_v18 }
 0x1ab   :  { %v763_v59 = vpop.eup %762  ;;  %v540_v5 = vmul.f32 %v761_v40, %v532_v11 }
 0x1ac   :  { %v541_v6 = vmul.f32 %v763_v59, %v532_v11 }
 0x1ad   :  { %v484_v61 = vpop.permute.xlu1 %483  ;;  %v524_v50 = vpop.permute.xlu0 %523 }
 0x1ae   :  { %v500_v52 = vadd.f32 %v484_v61, %v374_v17  ;;  %v501_v19 = vadd.f32 %v484_v61, %v375_v16  ;;  %v536_v8 = vmul.f32 %v745_v39, %v524_v50  ;;  %v537_v42 = vmul.f32 %v753_v0, %v524_v50  ;;  %v765_v13 = vpop.eup %764 }
 0x1af   :  { %v544_v33 = vmul.f32 %v757_v23, %v524_v50  ;;  %v545_v26 = vmul.f32 %v759_v51, %v524_v50  ;;  %v767_v37 = vpop.eup %766 }
 0x1b0   :  { %772 = vtanh.f32 %v500_v52  ;;  %v550_v55 = vadd.f32 %v536_v8, %v534_v45  ;;  %v559_v27 = vadd.f32 %v537_v42, %v535_v49  ;;  %v769_v31 = vpop.eup %768 }
 0x1b1   :  { %774 = vtanh.f32 %v501_v19  ;;  %v568_v32 = vadd.f32 %v544_v33, %v542_v60  ;;  %v577_v35 = vadd.f32 %v545_v26, %v543_v25  ;;  %v771_v28 = vpop.eup %770 }
 0x1b6   :  { %v773_v47 = vpop.eup %772  ;;  %v528_v36 = vpop.permute.xlu1 %527 }
 0x1b7   :  { %v775_v30 = vpop.eup %774  ;;  %v538_v34 = vmul.f32 %v765_v13, %v528_v36  ;;  %v539_v46 = vmul.f32 %v771_v28, %v528_v36  ;;  %v546_v10 = vmul.f32 %v767_v37, %v528_v36  ;;  %v547_v3 = vmul.f32 %v769_v31, %v528_v36 }
 0x1b8   :  { %v548_v44 = vmul.f32 %v773_v47, %v532_v11  ;;  %v549_v48 = vmul.f32 %v775_v30, %v532_v11 }
 0x1b9   :  { %v551_v54 = vadd.f32 %v550_v55, %v538_v34  ;;  %v560_v63 = vadd.f32 %v559_v27, %v539_v46  ;;  %v569_v9 = vadd.f32 %v568_v32, %v546_v10  ;;  %v578_v1 = vadd.f32 %v577_v35, %v547_v3 }
 0x1bb   :  { %v552_v22 = vadd.f32 %v551_v54, %v540_v5  ;;  %v561_v24 = vadd.f32 %v560_v63, %v541_v6  ;;  %v570_v7 = vadd.f32 %v569_v9, %v548_v44  ;;  %v579_v58 = vadd.f32 %v578_v1, %v549_v48 }
 0x1bd   :  { %v553_v14 = vrot.slane %v552_v22, 4  ;;  %v562_v15 = vrot.slane %v561_v24, 4  ;;  %v571_v39 = vrot.slane %v570_v7, 4  ;;  %v580_v20 = vrot.slane %v579_v58, 4 }
 0x1bf   :  { %v554_v38 = vadd.f32 %v553_v14, %v552_v22  ;;  %v563_v43 = vadd.f32 %v562_v15, %v561_v24  ;;  %v572_v53 = vadd.f32 %v571_v39, %v570_v7  ;;  %v581_v57 = vadd.f32 %v580_v20, %v579_v58  ;;  %v659_v58 = vld.sshfl [vmem:[#allocation1] sm:$0xff pattern:$0x75316420]  ;;  %v660_v15 = vld.sshfl [vmem:[#allocation1 + $0x8] sm:$0xff pattern:$0x75316420] }
 0x1c1   :  { %v555_v62 = vrot.slane %v554_v38, 2  ;;  %v564_v21 = vrot.slane %v563_v43, 2  ;;  %v573_v12 = vrot.slane %v572_v53, 2  ;;  %v582_v2 = vrot.slane %v581_v57, 2 }
 0x1c3   :  { %v556_v41 = vadd.f32 %v555_v62, %v554_v38  ;;  %v565_v29 = vadd.f32 %v564_v21, %v563_v43  ;;  %v574_v0 = vadd.f32 %v573_v12, %v572_v53  ;;  %v583_v56 = vadd.f32 %v582_v2, %v581_v57  ;;  %v663_v53 = vld.sshfl [vmem:[#allocation1 + $0x10] sm:$0xff pattern:$0x75316420]  ;;  %v664_v57 = vld.sshfl [vmem:[#allocation1 + $0x18] sm:$0xff pattern:$0x75316420] }
 0x1c5   :  { %v557_v18 = vrot.slane %v556_v41, 1  ;;  %v566_v4 = vrot.slane %v565_v29, 1  ;;  %v575_v17 = vrot.slane %v574_v0, 1  ;;  %v584_v16 = vrot.slane %v583_v56, 1 }
 0x1c7   :  { %v558_v23 = vadd.f32 %v557_v18, %v556_v41  ;;  %v567_v45 = vadd.f32 %v566_v4, %v565_v29  ;;  %v576_v49 = vadd.f32 %v575_v17, %v574_v0  ;;  %v585_v60 = vadd.f32 %v584_v16, %v583_v56 }
 0x1c9   :  { %v591_v61 = vsel %vm590_vm0, %v576_v49, %v558_v23  ;;  %v592_v50 = vsel %vm590_vm0, %v585_v60, %v567_v45 }
 0x1ca   :  { %v596_v51 = vsel %vm595_vm1, %v591_v61, -inf  ;;  %v597_v52 = vsel %vm595_vm1, %v592_v50, -inf }
 0x1cb   :  { %v598_v19 = vmax.f32 %v596_v51, %v597_v52  ;;  %v786_v52 = vld [vmem:[%s1194_s1] sm:$0x3] }
 0x1cd   :  { %599 = vmax.xlane.f32.xlu1 %v598_v19 }
 0x240   :  { %v600_v8 = vpop.xlane.xlu1 %599 }
 0x241   :  { %v602_v42 = vrot.slane %v600_v8, 1  ;;  %v605_v40 = vsub.f32 %v558_v23, %v600_v8  ;;  %v606_v25 = vsub.f32 %v567_v45, %v600_v8  ;;  %v1210_v23 = vlaneseq }
 0x243   :  { %v607_v33 = vsub.f32 %v576_v49, %v602_v42  ;;  %v608_v26 = vsub.f32 %v585_v60, %v602_v42  ;;  %v609_v59 = vmul.f32 1.442695, %v605_v40  ;;  %v611_v13 = vmul.f32 1.442695, %v606_v25 }
 0x244   :  { %v687_v45 = vand.u32 127, %v1210_v23 }
 0x245   :  { %v613_v55 = vmul.f32 1.442695, %v607_v33  ;;  %v615_v27 = vmul.f32 1.442695, %v608_v26 }
 0x247   :  { %776 = vpow2.f32 %v613_v55 }
 0x248   :  { %778 = vpow2.f32 %v615_v27 }
 0x249   :  { %780 = vpow2.f32 %v609_v59 }
 0x24a   :  { %782 = vpow2.f32 %v611_v13 }
 0x24d   :  { %v777_v32 = vpop.eup %776 }
 0x24e   :  { %v779_v35 = vpop.eup %778  ;;  %v621_v37 = vrot.slane %v777_v32, 7 }
 0x24f   :  { %v781_v31 = vpop.eup %780  ;;  %v623_v28 = vrot.slane %v779_v35, 7 }
 0x250   :  { %v783_v11 = vpop.eup %782  ;;  %v622_v47 = vsel %vm590_vm0, %v621_v37, %v781_v31 }
 0x251   :  { %v624_v36 = vsel %vm590_vm0, %v623_v28, %v783_v11  ;;  %v627_v30 = vsel %vm595_vm1, %v622_v47, 0.0 }
 0x252   :  { %v628_v34 = vsel %vm595_vm1, %v624_v36, 0.0 }
 0x253   :  { %v629_v46 = vadd.f32 %v628_v34, %v627_v30 }
 0x255   :  { %630 = vadd.xlane.f32.xlu2 %v629_v46 }
 0x2c8   :  { %v631_v10 = vpop.xlane.xlu2 %630 }
 0x2c9   :  { %784 = vrcp.f32 %v631_v10  ;;  %v643_v44 = vand.u32 2147483648, %v631_v10  ;;  %v641_v63 = vand.u32 2147483647, %v631_v10  ;;  %vm637_vm3 = vweird.f32 %v631_v10 }
 0x2cb   :  { %v644_v48 = vor.u32 1.1754944e-38, %v643_v44  ;;  %vm642_vm5 = vcmp.eq.f32.partialorder %v641_v63, 8.507059e+37 }
 0x2cf   :  { %v785_v5 = vpop.eup %784 }
 0x2d0   :  { %v633_v6 = vmul.f32 %v785_v5, %v631_v10  ;;  %vm638_vm2 = vweird.f32 %v785_v5 }
 0x2d1   :  { %vm639_vm4 = vmor %vm637_vm3, %vm638_vm2 }
 0x2d2   :  { %v634_v3 = vsub.f32 1.0, %v633_v6 }
 0x2d4   :  { %v635_v54 = vmul.f32 %v785_v5, %v634_v3 }
 0x2d6   :  { %v636_v9 = vadd.f32 %v785_v5, %v635_v54 }
 0x2d8   :  { %v640_v1 = vsel %vm639_vm4, %v785_v5, %v636_v9 }
 0x2d9   :  { %v645_v22 = vsel %vm642_vm5, %v644_v48, %v640_v1 }
 0x2da   :  { %v650_v24 = vmul.f32 %v781_v31, %v645_v22  ;;  %v651_v7 = vmul.f32 %v783_v11, %v645_v22  ;;  %v647_v14 = vrot.slane %v645_v22, 1 }
 0x2dc   :  { %v654_v39 = vperm.slane %v650_v24, 0  ;;  %v655_v20 = vperm.slane %v651_v7, 0  ;;  %v652_v38 = vmul.f32 %v777_v32, %v647_v14  ;;  %v653_v43 = vmul.f32 %v779_v35, %v647_v14 }
 0x2de   :  { %v669_v62 = vmul.f32 %v659_v58, %v654_v39  ;;  %v670_v21 = vmul.f32 %v660_v15, %v655_v20  ;;  %v656_v12 = vperm.slane %v652_v38, 0  ;;  %v657_v2 = vperm.slane %v653_v43, 0 }
 0x2e0   :  { %v674_v41 = vsel %vm673_vm6, %v669_v62, 0.0  ;;  %v675_v29 = vsel %vm673_vm6, %v670_v21, 0.0  ;;  %v671_v0 = vmul.f32 %v663_v53, %v656_v12  ;;  %v672_v56 = vmul.f32 %v664_v57, %v657_v2 }
 0x2e1   :  { %v676_v18 = vadd.f32 %v675_v29, %v674_v41 }
 0x2e2   :  { %v679_v4 = vsel %vm673_vm6, %v671_v0, 0.0  ;;  %v680_v17 = vsel %vm673_vm6, %v672_v56, 0.0 }
 0x2e3   :  { %677 = vadd.xlane.f32.xlu0 %v676_v18  ;;  %v681_v16 = vadd.f32 %v680_v17, %v679_v4 }
 0x2e5   :  { %682 = vadd.xlane.f32.xlu2 %v681_v16 }
 0x356   :  { %v678_v49 = vpop.xlane.xlu0 %677 }
 0x357   :  { %v688_v61 = vperm.slane %v678_v49, %v687_v45 }
 0x358   :  { %v683_v60 = vpop.xlane.xlu2 %682 }
 0x359   :  { %v689_v50 = vperm.slane %v683_v60, %v687_v45 }
 0x35b   :  { %v690_v51 = vsel %vm590_vm0, %v689_v50, %v688_v61 }
 0x35c   :  { %v692_v19 = vadd.f32 %v786_v52, %v690_v51 }
 0x35e   :  { %694 = vst.msk [vmem:[#allocation2] sm:$0x3] %vm693_vm7, %v692_v19 }
 0x35f   :  { %705 = dma.vmem_to_hbm [thread:$0]  %s701_s29, 32, %s703_s5, [#allocation3]  }
 0x360   :  { %811 = dma.done.wait [#allocation3], 32  }
 0x361   :  { %812 = vsyncadd [#allocation3], 4294967264 }
 0x362   :  { %710 = vsyncpa [#allocation3], 1 }

</bundles_post_ra>
